<compile_context>
chip_gen: v7x
topology: tpu7x:2x2x1
jax: 0.10.0
libtpu: 0.0.40
codegen_flags: <defaults>
</compile_context>

<pallas_src>
import functools

import jax
import jax.numpy as jnp
from jax import lax
from jax.experimental import pallas as pl
from jax.experimental.pallas import tpu as pltpu


# ----------------------------------------------------------------------------
# helpers
# ----------------------------------------------------------------------------
def _scoped_vmem_limit():
    """Generation-aware scoped-VMEM budget (3/4 of physical, capped)."""
    try:
        cap = pltpu.get_tpu_info().vmem_capacity_bytes
    except Exception:
        cap = 64 << 20                       # conservative (v7x has 64 MiB / TC)
    return int(min(100 << 20, max(32 << 20, (cap * 3) // 4)))


def _pick_tile(s, target):
    """Largest query tile <= target that divides S and is sublane aligned."""
    if s <= target:
        return s
    for t in range(target, 7, -1):
        if s % t == 0 and t % 8 == 0:
            return t
    return s                                 # fall back: no tiling (always valid)


# ----------------------------------------------------------------------------
# Kernel 1: exact pairwise distances + packed-key top-k-smallest neighbor indices
# ----------------------------------------------------------------------------
def _neighbor_idx_kernel(xq_ref, xkt_ref, idx_ref, *, num_neighbors, coord_dim, low_bits):
    qi = pl.program_id(1)
    tq = xq_ref.shape[1]
    s = xkt_ref.shape[2]

    xq = xq_ref[0]                                        # (Tq, 8)  fp32 query coords
    xkt = xkt_ref[0]                                      # (8, S)   fp32 coords, transposed

    # Exact fp32 squared distance on the VPU (3 coords -> 3 broadcast sub/mul/add passes).
    dist = jnp.zeros((tq, s), jnp.float32)
    for c in range(coord_dim):
        d = xq[:, c:c + 1] - xkt[c:c + 1, :]              # (Tq, S) broadcast
        dist = dist + d * d                               # always >= 0

    # Packed sortable key: non-negative float bits (monotone as int32) in the high bits,
    # column index in the low bits -> one min-reduction + one select per neighbor.
    col = lax.broadcasted_iota(jnp.int32, (tq, s), 1)
    row = lax.broadcasted_iota(jnp.int32, (tq, s), 0) + qi * tq
    bits = pltpu.bitcast(dist, jnp.int32)
    hi_mask = jnp.int32(~((1 << low_bits) - 1))
    lo_mask = jnp.int32((1 << low_bits) - 1)
    big = jnp.int32(0x7FFFFFFF)
    key = (bits & hi_mask) | col
    key = jnp.where(row == col, big, key)                 # exclude self

    colk = lax.broadcasted_iota(jnp.int32, (tq, num_neighbors), 1)
    idxs = jnp.zeros((tq, num_neighbors), jnp.int32)
    for j in range(num_neighbors):
        kmin = jnp.min(key, axis=-1, keepdims=True)       # (Tq, 1)  one XLU reduction
        sel = kmin & lo_mask                              # column index of the winner
        idxs = jnp.where(colk == j, sel, idxs)
        key = jnp.where(key == kmin, big, key)            # one select to mask it out
    idx_ref[0] = idxs


def compute_neighbor_indices(coords, num_neighbors, *, q_tile=512):
    """(B, S, K) int32 nearest-neighbor indices (self excluded)."""
    b, s, c = coords.shape
    assert num_neighbors < s, "num_neighbors must be < seq_len (self is excluded)"
    cpad = 8                                              # one full sublane of coords
    coords = coords.astype(jnp.float32)
    xq = jnp.pad(coords, ((0, 0), (0, 0), (0, cpad - c)))                     # (B, S, 8)
    xkt = jnp.pad(jnp.swapaxes(coords, 1, 2), ((0, 0), (0, cpad - c), (0, 0)))  # (B, 8, S)

    tq = _pick_tile(s, q_tile)
    low_bits = max(1, (s - 1).bit_length())
    kernel = functools.partial(_neighbor_idx_kernel, num_neighbors=num_neighbors,
                               coord_dim=c, low_bits=low_bits)
    return pl.pallas_call(
        kernel,
        out_shape=jax.ShapeDtypeStruct((b, s, num_neighbors), jnp.int32),
        grid=(b, s // tq),
        in_specs=[pl.BlockSpec((1, tq, cpad), lambda i, j: (i, j, 0)),
                  pl.BlockSpec((1, cpad, s), lambda i, j: (i, 0, 0))],   # resident across qi
        out_specs=pl.BlockSpec((1, tq, num_neighbors), lambda i, j: (i, j, 0)),
        compiler_params=pltpu.CompilerParams(
            dimension_semantics=("parallel", "parallel"),
            vmem_limit_bytes=_scoped_vmem_limit()),
    )(xq, xkt)


# ----------------------------------------------------------------------------
# Kernel 2: nearest-neighbor attention (resident kv, batched MXU gather, online softmax)
# ----------------------------------------------------------------------------
def _nn_attention_kernel(x_full_ref, x_tile_ref, wq_ref, wkv_ref, seg_sum_ref,
                         seg_bcast_ref, mean_ref, idx_ref, out_ref, metric_ref, kv_ref,
                         *, num_heads, num_neighbors, scale):
    qi = pl.program_id(1)
    tq = x_tile_ref.shape[1]
    f = x_tile_ref.shape[2]
    s = x_full_ref.shape[1]

    # --- full-length K/V projection, once per batch (query axis is "arbitrary") ---
    @pl.when(qi == 0)
    def _():
        kv_ref[...] = jnp.dot(x_full_ref[0], wkv_ref[...],
                              preferred_element_type=jnp.float32).astype(jnp.bfloat16)

    # --- per-tile Q projection (bf16 in, fp32 acc) ---
    q = jnp.dot(x_tile_ref[0], wq_ref[...], preferred_element_type=jnp.float32)  # (Tq, F)

    kv = kv_ref[...]                                                   # (S, 2F) bf16
    idx = idx_ref[0]                                                   # (Tq, K) int32

    # --- batched neighbor gather: ONE (K*Tq, S) @ (S, 2F) MXU matmul ---
    col = lax.broadcasted_iota(jnp.int32, (tq, s), 1)
    onehot_all = jnp.concatenate(
        [(idx[:, j:j + 1] == col).astype(jnp.bfloat16) for j in range(num_neighbors)],
        axis=0)                                                        # (K*Tq, S)
    kv_all = jnp.dot(onehot_all, kv, preferred_element_type=jnp.float32)  # (K*Tq, 2F)

    seg_sum = seg_sum_ref[...]                                         # (F, H)  bf16
    seg_bcast = seg_bcast_ref[...]                                     # (H, F)  f32

    # --- online softmax over the K neighbors (fp32 running state) ---
    m_run = jnp.full((tq, num_heads), -jnp.inf, dtype=jnp.float32)
    l_run = jnp.zeros((tq, num_heads), dtype=jnp.float32)
    acc = jnp.zeros((tq, f), dtype=jnp.float32)
    for j in range(num_neighbors):
        kv_j = kv_all[j * tq:(j + 1) * tq, :]                          # sublane slice
        k_j = kv_j[:, :f]
        v_j = kv_j[:, f:]
        # per-head q . k reduction via the block-diagonal matmul: (Tq, F) @ (F, H)
        s_j = jnp.dot((q * k_j).astype(jnp.bfloat16), seg_sum,
                      preferred_element_type=jnp.float32) * scale      # (Tq, H)
        m_new = jnp.maximum(m_run, s_j)
        alpha = jnp.exp(m_run - m_new)
        p = jnp.exp(s_j - m_new)
        l_run = alpha * l_run + p
        # broadcast per-head scalars across the head lanes with the exact 0/1 matrix
        alpha_f = jnp.dot(alpha, seg_bcast, preferred_element_type=jnp.float32)
        p_f = jnp.dot(p, seg_bcast, preferred_element_type=jnp.float32)
        acc = alpha_f * acc + p_f * v_j
        m_run = m_new

    inv_l = pl.reciprocal(l_run, approx=True)                          # (Tq, H)
    inv_f = jnp.dot(inv_l, seg_bcast, preferred_element_type=jnp.float32)
    out_ref[0] = (acc * inv_f).astype(jnp.bfloat16)                    # lane-dense store

    # --- metric = key.mean(heads) for this query tile, from the resident kv scratch ---
    start = pl.multiple_of(qi * tq, 8)
    k_tile = kv_ref[pl.ds(start, tq), :f]                              # (Tq, F) bf16
    metric_ref[0] = jnp.dot(k_tile, mean_ref[...],
                            preferred_element_type=jnp.float32).astype(jnp.bfloat16)


def nn_attention(x, idx, wq, wk, wv, num_heads, *, q_tile=256):
    b, s, f = x.shape
    head_dim = f // num_heads
    k_nb = idx.shape[-1]
    scale = head_dim ** (-0.5)
    tq = _pick_tile(s, q_tile)

    # bf16 input (torch autocast casts the Linear input anyway) -> half the x DMA.
    x_bf = x.astype(jnp.bfloat16)
    # Weights pre-transposed to (F, out) and pre-cast to bf16 -> resident, no in-kernel cast.
    w_q_t = wq.T.astype(jnp.bfloat16)                                  # (F, F)
    w_kv_t = jnp.concatenate([wk, wv], axis=0).T.astype(jnp.bfloat16)  # (F, 2F)

    # Tiny per-head constant matrices, built once and kept resident across the grid.
    hmap = jnp.arange(f, dtype=jnp.int32) // head_dim
    seg_sum = (hmap[:, None] == jnp.arange(num_heads, dtype=jnp.int32)[None, :]
               ).astype(jnp.bfloat16)                                  # (F, H) reduce
    seg_bcast = (jnp.arange(num_heads, dtype=jnp.int32)[:, None] == hmap[None, :]
                 ).astype(jnp.float32)                                 # (H, F) broadcast
    dmap = jnp.arange(f, dtype=jnp.int32) % head_dim
    mean_mat = ((dmap[:, None] == jnp.arange(head_dim, dtype=jnp.int32)[None, :]
                 ).astype(jnp.float32) / num_heads).astype(jnp.bfloat16)  # (F, Dh)

    kernel = functools.partial(_nn_attention_kernel, num_heads=num_heads,
                               num_neighbors=k_nb, scale=scale)
    const2d = lambda i, j: (0, 0)

    # TODO(synk): above S ~ 1-2K, replace the one-hot matmul gather with a true DMA/take
    # gather (idx scalar-prefetched into SMEM) and benchmark the crossover (biggest on v5e).
    # TODO(synk): at very small S, fold several batch elements per grid step to fill vregs
    # and amortize the ~0.35 us per-grid-step overhead.
    out, metric = pl.pallas_call(
        kernel,
        out_shape=(jax.ShapeDtypeStruct((b, s, f), jnp.bfloat16),
                   jax.ShapeDtypeStruct((b, s, head_dim), jnp.bfloat16)),
        grid=(b, s // tq),
        in_specs=[pl.BlockSpec((1, s, f), lambda i, j: (i, 0, 0)),     # x full (kv @ qi==0)
                  pl.BlockSpec((1, tq, f), lambda i, j: (i, j, 0)),    # x tile (q proj)
                  pl.BlockSpec((f, f), const2d),                       # Wq^T     (resident)
                  pl.BlockSpec((f, 2 * f), const2d),                   # [Wk;Wv]^T(resident)
                  pl.BlockSpec((f, num_heads), const2d),               # seg_sum  (resident)
                  pl.BlockSpec((num_heads, f), const2d),               # seg_bcast(resident)
                  pl.BlockSpec((f, head_dim), const2d),                # head-mean(resident)
                  pl.BlockSpec((1, tq, k_nb), lambda i, j: (i, j, 0))],
        out_specs=(pl.BlockSpec((1, tq, f), lambda i, j: (i, j, 0)),
                   pl.BlockSpec((1, tq, head_dim), lambda i, j: (i, j, 0))),
        scratch_shapes=[pltpu.VMEM((s, 2 * f), jnp.bfloat16)],         # resident K/V
        compiler_params=pltpu.CompilerParams(
            dimension_semantics=("parallel", "arbitrary"),
            vmem_limit_bytes=_scoped_vmem_limit()),
    )(x_bf, x_bf, w_q_t, w_kv_t, seg_sum, seg_bcast, mean_mat, idx.astype(jnp.int32))
    return out, metric


def nearest_neighbor_attention_forward(x, coords, wq, wk, wv, num_heads, num_neighbors):
    # TODO(synk): optionally fuse the neighbor-index computation into the attention kernel
    # to avoid the small (B, S, K) HBM round trip and extra launch.
    idx = compute_neighbor_indices(coords, num_neighbors)
    return nn_attention(x, idx, wq, wk, wv, num_heads)


# ----------------------------------------------------------------------------
# Pure-JAX fp32 reference (true neighbor gather, matches the torch module)
# ----------------------------------------------------------------------------
def reference(x, idx, wq, wk, wv, num_heads):
    b, s, f = x.shape
    dh = f // num_heads
    scale = dh ** (-0.5)
    q = (x @ wq.T).reshape(b, s, num_heads, dh)
    k = (x @ wk.T).reshape(b, s, num_heads, dh)
    v = (x @ wv.T).reshape(b, s, num_heads, dh)
    bidx = jnp.arange(b)[:, None, None]
    k_n = k[bidx, idx]                                   # (B, S, K, H, Dh)
    v_n = v[bidx, idx]
    scores = jnp.einsum('bshd,bskhd->bshk', q, k_n) * scale
    probs = jax.nn.softmax(scores, axis=-1)
    out = jnp.einsum('bshk,bskhd->bshd', probs, v_n).reshape(b, s, f)
    metric = k.mean(axis=2)                              # mean over heads -> (B, S, Dh)
    return out, metric


if __name__ == "__main__":
    B, S, F, H, K = 2, 16, 32, 4, 4          # batch, seq, feature_dim, heads, neighbors
    key = jax.random.PRNGKey(0)
    k1, k2, k3, k4, k5 = jax.random.split(key, 5)
    x = jax.random.normal(k1, (B, S, F), jnp.float32)
    coords = jax.random.normal(k2, (B, S, 3), jnp.float32)
    w_scale = 1.0 / (F ** 0.5)
    wq = jax.random.normal(k3, (F, F), jnp.float32) * w_scale
    wk = jax.random.normal(k4, (F, F), jnp.float32) * w_scale
    wv = jax.random.normal(k5, (F, F), jnp.float32) * w_scale

    idx = compute_neighbor_indices(coords, K)
    out, metric = nn_attention(x, idx, wq, wk, wv, H)
    idx, out, metric = jax.block_until_ready((idx, out, metric))

    assert idx.shape == (B, S, K) and idx.dtype == jnp.int32
    assert out.shape == (B, S, F) and out.dtype == jnp.bfloat16
    assert metric.shape == (B, S, F // H) and metric.dtype == jnp.bfloat16

    # Neighbor check (tie robust): distances gathered at the kernel's indices must equal
    # the K smallest distances per row (both ascending).
    sq = jnp.sum(coords * coords, axis=-1)
    d_ref = sq[:, :, None] + sq[:, None, :] - 2.0 * jnp.einsum('bic,bjc->bij', coords, coords)
    d_ref = jnp.where(jnp.eye(S, dtype=bool)[None], jnp.inf, d_ref)
    ref_vals = -lax.top_k(-d_ref, K)[0]
    got_vals = jnp.take_along_axis(d_ref, idx, axis=-1)
    assert jnp.allclose(got_vals, ref_vals, rtol=1e-3, atol=1e-3)

    # Attention check vs fp32 reference.
    ref_out, ref_metric = reference(x, idx, wq, wk, wv, H)
    assert jnp.allclose(out.astype(jnp.float32), ref_out, rtol=5e-2, atol=5e-2)
    assert jnp.allclose(metric.astype(jnp.float32), ref_metric, rtol=5e-2, atol=5e-2)

    print("KERNEL_OK")
</pallas_src>

<mosaic_0001>
module attributes {stable_mosaic.version = 11 : i64} {
  func.func @_neighbor_idx_kernel(%arg0: i32, %arg1: i32, %arg2: memref<1x16x8xf32, #tpu.memory_space<vmem>>, %arg3: memref<1x8x16xf32, #tpu.memory_space<vmem>>, %arg4: memref<1x16x4xi32, #tpu.memory_space<vmem>>) attributes {dimension_semantics = [#tpu.dimension_semantics<parallel>, #tpu.dimension_semantics<parallel>], iteration_bounds = array<i64: 2, 1>, scalar_prefetch = 0 : i64, scratch_operands = 0 : i64, tpu.core_type = #tpu.core_type<tc>, window_params = [{transform_indices = @transform_0, window_bounds = array<i64: 1, 16, 8>}, {transform_indices = @transform_1, window_bounds = array<i64: 1, 8, 16>}, {transform_indices = @transform_2, window_bounds = array<i64: 1, 16, 4>}]} {
    %c0 = arith.constant 0 : index
    %c0_0 = arith.constant 0 : index
    %c0_1 = arith.constant 0 : index
    %0 = vector.load %arg2[%c0, %c0_0, %c0_1] : memref<1x16x8xf32, #tpu.memory_space<vmem>>, vector<1x16x8xf32>
    %1 = vector.shape_cast %0 : vector<1x16x8xf32> to vector<16x8xf32>
    %c0_2 = arith.constant 0 : index
    %c0_3 = arith.constant 0 : index
    %c0_4 = arith.constant 0 : index
    %2 = vector.load %arg3[%c0_2, %c0_3, %c0_4] : memref<1x8x16xf32, #tpu.memory_space<vmem>>, vector<1x8x16xf32>
    %3 = vector.shape_cast %2 : vector<1x8x16xf32> to vector<8x16xf32>
    %cst = arith.constant 0.000000e+00 : f32
    %4 = vector.broadcast %cst : f32 to vector<16x16xf32>
    %5 = vector.extract_strided_slice %1 {offsets = [0, 0], sizes = [16, 1], strides = [1, 1]} : vector<16x8xf32> to vector<16x1xf32>
    %6 = vector.extract_strided_slice %3 {offsets = [0, 0], sizes = [1, 16], strides = [1, 1]} : vector<8x16xf32> to vector<1x16xf32>
    %7 = vector.broadcast %5 : vector<16x1xf32> to vector<16x16xf32>
    %8 = vector.broadcast %6 : vector<1x16xf32> to vector<16x16xf32>
    %9 = arith.subf %7, %8 : vector<16x16xf32>
    %10 = arith.mulf %9, %9 : vector<16x16xf32>
    %11 = arith.addf %4, %10 : vector<16x16xf32>
    %12 = vector.extract_strided_slice %1 {offsets = [0, 1], sizes = [16, 1], strides = [1, 1]} : vector<16x8xf32> to vector<16x1xf32>
    %13 = vector.extract_strided_slice %3 {offsets = [1, 0], sizes = [1, 16], strides = [1, 1]} : vector<8x16xf32> to vector<1x16xf32>
    %14 = vector.broadcast %12 : vector<16x1xf32> to vector<16x16xf32>
    %15 = vector.broadcast %13 : vector<1x16xf32> to vector<16x16xf32>
    %16 = arith.subf %14, %15 : vector<16x16xf32>
    %17 = arith.mulf %16, %16 : vector<16x16xf32>
    %18 = arith.addf %11, %17 : vector<16x16xf32>
    %19 = vector.extract_strided_slice %1 {offsets = [0, 2], sizes = [16, 1], strides = [1, 1]} : vector<16x8xf32> to vector<16x1xf32>
    %20 = vector.extract_strided_slice %3 {offsets = [2, 0], sizes = [1, 16], strides = [1, 1]} : vector<8x16xf32> to vector<1x16xf32>
    %21 = vector.broadcast %19 : vector<16x1xf32> to vector<16x16xf32>
    %22 = vector.broadcast %20 : vector<1x16xf32> to vector<16x16xf32>
    %23 = arith.subf %21, %22 : vector<16x16xf32>
    %24 = arith.mulf %23, %23 : vector<16x16xf32>
    %25 = arith.addf %18, %24 : vector<16x16xf32>
    %26 = tpu.iota {dimensions = array<i32: 1>} : vector<16x16xi32>
    %27 = tpu.iota {dimensions = array<i32: 0>} : vector<16x16xi32>
    %c16_i32 = arith.constant 16 : i32
    %28 = arith.muli %arg1, %c16_i32 : i32
    %29 = vector.broadcast %28 : i32 to vector<16x16xi32>
    %30 = arith.addi %27, %29 : vector<16x16xi32>
    %31 = tpu.bitcast %25 : vector<16x16xf32> -> vector<16x16xi32>
    %c-16_i32 = arith.constant -16 : i32
    %32 = vector.broadcast %c-16_i32 : i32 to vector<16x16xi32>
    %33 = arith.andi %31, %32 : vector<16x16xi32>
    %34 = arith.ori %33, %26 : vector<16x16xi32>
    %35 = arith.cmpi eq, %30, %26 : vector<16x16xi32>
    %c2147483647_i32 = arith.constant 2147483647 : i32
    %36 = vector.broadcast %c2147483647_i32 : i32 to vector<16x16xi32>
    %37 = arith.select %35, %36, %34 : vector<16x16xi1>, vector<16x16xi32>
    %38 = tpu.iota {dimensions = array<i32: 1>} : vector<16x4xi32>
    %c0_i32 = arith.constant 0 : i32
    %39 = vector.broadcast %c0_i32 : i32 to vector<16x4xi32>
    %cst_5 = arith.constant dense<2147483647> : vector<16xi32>
    %40 = vector.multi_reduction <minsi>, %37, %cst_5 [1] : vector<16x16xi32> to vector<16xi32>
    %41 = vector.shape_cast %40 : vector<16xi32> to vector<16x1xi32>
    %c15_i32 = arith.constant 15 : i32
    %42 = vector.broadcast %c15_i32 : i32 to vector<16x1xi32>
    %43 = arith.andi %41, %42 : vector<16x1xi32>
    %c0_i32_6 = arith.constant 0 : i32
    %44 = vector.broadcast %c0_i32_6 : i32 to vector<16x4xi32>
    %45 = arith.cmpi eq, %38, %44 : vector<16x4xi32>
    %46 = vector.shape_cast %43 : vector<16x1xi32> to vector<16x1xi32>
    %47 = vector.broadcast %46 : vector<16x1xi32> to vector<16x4xi32>
    %48 = arith.select %45, %47, %39 : vector<16x4xi1>, vector<16x4xi32>
    %49 = vector.broadcast %41 : vector<16x1xi32> to vector<16x16xi32>
    %50 = arith.cmpi eq, %37, %49 : vector<16x16xi32>
    %c2147483647_i32_7 = arith.constant 2147483647 : i32
    %51 = vector.broadcast %c2147483647_i32_7 : i32 to vector<16x16xi32>
    %52 = arith.select %50, %51, %37 : vector<16x16xi1>, vector<16x16xi32>
    %cst_8 = arith.constant dense<2147483647> : vector<16xi32>
    %53 = vector.multi_reduction <minsi>, %52, %cst_8 [1] : vector<16x16xi32> to vector<16xi32>
    %54 = vector.shape_cast %53 : vector<16xi32> to vector<16x1xi32>
    %c15_i32_9 = arith.constant 15 : i32
    %55 = vector.broadcast %c15_i32_9 : i32 to vector<16x1xi32>
    %56 = arith.andi %54, %55 : vector<16x1xi32>
    %c1_i32 = arith.constant 1 : i32
    %57 = vector.broadcast %c1_i32 : i32 to vector<16x4xi32>
    %58 = arith.cmpi eq, %38, %57 : vector<16x4xi32>
    %59 = vector.shape_cast %56 : vector<16x1xi32> to vector<16x1xi32>
    %60 = vector.broadcast %59 : vector<16x1xi32> to vector<16x4xi32>
    %61 = arith.select %58, %60, %48 : vector<16x4xi1>, vector<16x4xi32>
    %62 = vector.broadcast %54 : vector<16x1xi32> to vector<16x16xi32>
    %63 = arith.cmpi eq, %52, %62 : vector<16x16xi32>
    %c2147483647_i32_10 = arith.constant 2147483647 : i32
    %64 = vector.broadcast %c2147483647_i32_10 : i32 to vector<16x16xi32>
    %65 = arith.select %63, %64, %52 : vector<16x16xi1>, vector<16x16xi32>
    %cst_11 = arith.constant dense<2147483647> : vector<16xi32>
    %66 = vector.multi_reduction <minsi>, %65, %cst_11 [1] : vector<16x16xi32> to vector<16xi32>
    %67 = vector.shape_cast %66 : vector<16xi32> to vector<16x1xi32>
    %c15_i32_12 = arith.constant 15 : i32
    %68 = vector.broadcast %c15_i32_12 : i32 to vector<16x1xi32>
    %69 = arith.andi %67, %68 : vector<16x1xi32>
    %c2_i32 = arith.constant 2 : i32
    %70 = vector.broadcast %c2_i32 : i32 to vector<16x4xi32>
    %71 = arith.cmpi eq, %38, %70 : vector<16x4xi32>
    %72 = vector.shape_cast %69 : vector<16x1xi32> to vector<16x1xi32>
    %73 = vector.broadcast %72 : vector<16x1xi32> to vector<16x4xi32>
    %74 = arith.select %71, %73, %61 : vector<16x4xi1>, vector<16x4xi32>
    %75 = vector.broadcast %67 : vector<16x1xi32> to vector<16x16xi32>
    %76 = arith.cmpi eq, %65, %75 : vector<16x16xi32>
    %c2147483647_i32_13 = arith.constant 2147483647 : i32
    %77 = vector.broadcast %c2147483647_i32_13 : i32 to vector<16x16xi32>
    %78 = arith.select %76, %77, %65 : vector<16x16xi1>, vector<16x16xi32>
    %cst_14 = arith.constant dense<2147483647> : vector<16xi32>
    %79 = vector.multi_reduction <minsi>, %78, %cst_14 [1] : vector<16x16xi32> to vector<16xi32>
    %80 = vector.shape_cast %79 : vector<16xi32> to vector<16x1xi32>
    %c15_i32_15 = arith.constant 15 : i32
    %81 = vector.broadcast %c15_i32_15 : i32 to vector<16x1xi32>
    %82 = arith.andi %80, %81 : vector<16x1xi32>
    %c3_i32 = arith.constant 3 : i32
    %83 = vector.broadcast %c3_i32 : i32 to vector<16x4xi32>
    %84 = arith.cmpi eq, %38, %83 : vector<16x4xi32>
    %85 = vector.shape_cast %82 : vector<16x1xi32> to vector<16x1xi32>
    %86 = vector.broadcast %85 : vector<16x1xi32> to vector<16x4xi32>
    %87 = arith.select %84, %86, %74 : vector<16x4xi1>, vector<16x4xi32>
    %c0_16 = arith.constant 0 : index
    %c0_17 = arith.constant 0 : index
    %c0_18 = arith.constant 0 : index
    %88 = vector.load %arg4[%c0_16, %c0_17, %c0_18] : memref<1x16x4xi32, #tpu.memory_space<vmem>>, vector<1x16x4xi32>
    %89 = vector.shape_cast %88 : vector<1x16x4xi32> to vector<16x4xi32>
    %90 = vector.shape_cast %87 : vector<16x4xi32> to vector<1x16x4xi32>
    tpu.vector_store %arg4[%c0_16, %c0_17, %c0_18], %90 {strides = array<i32>} : memref<1x16x4xi32, #tpu.memory_space<vmem>>, vector<1x16x4xi32>,
    return
  }
  func.func @transform_0(%arg0: i32, %arg1: i32) -> (i32, i32, i32) {
    %c0_i32 = arith.constant 0 : i32
    %c0_i32_0 = arith.constant 0 : i32
    return %arg0, %arg1, %c0_i32 : i32, i32, i32
  }
  func.func @transform_1(%arg0: i32, %arg1: i32) -> (i32, i32, i32) {
    %c0_i32 = arith.constant 0 : i32
    %c0_i32_0 = arith.constant 0 : i32
    %c0_i32_1 = arith.constant 0 : i32
    return %arg0, %c0_i32, %c0_i32_0 : i32, i32, i32
  }
  func.func @transform_2(%arg0: i32, %arg1: i32) -> (i32, i32, i32) {
    %c0_i32 = arith.constant 0 : i32
    %c0_i32_0 = arith.constant 0 : i32
    return %arg0, %arg1, %c0_i32 : i32, i32, i32
  }
}

</mosaic_0001>

<bundles_post_ra>
// kernel: tpu_custom_call.1
= control target key start
LH: loop header
LB: loop body
LE: loop exit
PB: predicated region body
PF: predicated region fallthrough
CT: control target
= control target key end

     0   :  { %s620_s9 = smov 0   ;;  %s622_s10 = smov 0   ;;  %s682_s0 = inlined_call_operand.vmem [shape: f32[2,16,8], index: 0, kind: input, shape index: {}]   ;;  %s683_s1 = inlined_call_operand.vmem [shape: f32[2,8,16], index: 1, kind: input, shape index: {}]   ;;  %s684_s2 = inlined_call_operand.vmem [shape: s32[2,16,4], index: 2, kind: output, shape index: {}]  }
   0x1   :  { %s624_s11 = smov 0  }
   0x2 LB: > { %s24_s12 = sadd.s32 1, %s596_s10  ;;  %p537_p0 = scmp.ge.s32.totalorder %s600_s11, 1  ;;  %s600_s11 = sphi %s624_s11, %s12_s11   ;;  %s596_s10 = sphi %s622_s10, %s686_s10   ;;  %s592_s9 = sphi %s620_s9, %s685_s9  }
   0x3   : > { %p26_p1 = scmp.ge.s32.totalorder %s24_s12, 2  ;;  %p142_p2 = scmp.lt.s32.totalorder %s600_s11, 3 }
   0x5   : > { %s688_s12 = smov (%p26_p1, %s24_s12), 0  ;;  %p143_p3 = pnand %p537_p0, %p142_p2 }
   0x6   : > { %p177_p4 = scmp.lt.s32.totalorder (!%p143_p3), %s592_s9, 1  ;;  %v602_v0 = vmov (!%p143_p3), 1   ;;  %v603_v1 = vmov (!%p143_p3), 0   ;;  %v604_v4 = vmov (!%p143_p3), 2   ;;  %v213_v5 = vlaneseq (!%p143_p3) }
   0x7   : > { %146 = sbr.rel (%p143_p3) target bundleno = 1356 (0x54c), region = 28  ;;  %575 = vset.pattern.permute.xlu1 (!%p143_p3), %v602_v0  ;;  %574 = vset.pattern.permute.xlu0 (!%p143_p3), %v603_v1  ;;  %vm278_vm2 = vcmask (!%p143_p3), 130048  }
   0x8   : > { %v214_v6 = vshrl.u32 (!%p143_p3), %v213_v5, 7  ;;  %v650_v34 = vand.u32 (!%p143_p3), 127, %v213_v5 }
   0xa   : > { %v233_v7 = vsub.s32 (!%p143_p3), 1, %v214_v6  ;;  %v215_v8 = vsub.s32 (!%p143_p3), 0, %v214_v6  ;;  %v251_v14 = vsub.s32 (!%p143_p3), 2, %v214_v6  ;;  %v263_v35 = vadd.s32 (!%p143_p3), 8, %v214_v6 }
   0xb   : > { %vm274_vm1 = vcmp.eq.s32.totalorder (!%p143_p3), %v214_v6, %v650_v34  ;;  %vm311_vm9 = vcmp.eq.s32.totalorder (!%p143_p3), %v650_v34, 0  ;;  %vm350_vm10 = vcmp.eq.s32.totalorder (!%p143_p3), %v650_v34, 1  ;;  %vm389_vm15 = vcmp.eq.s32.totalorder (!%p143_p3), %v650_v34, 2 }
   0xc   : > { %vm275_vm0 = vcmp.eq.s32.totalorder (!%p143_p3), %v263_v35, %v650_v34 }
   0xe   : > { %s690_s9 = smov (!%p177_p4, %s592_s9), 1 }
   0xf   : > { %s545_s13 = sshll.u32 %s690_s9, 4  ;;  %s540_s17 = sshll.u32 %s690_s9, 3 }
  0x10   : > { %s184_s16 = scalar_lea.vmem %s682_s0, %s545_s13  ;;  %s189_s20 = scalar_lea.vmem %s683_s1, %s540_s17 }
  0x11   : > { %v200_v2 = vld [vmem:[%s184_s16] sm:$0xff]  ;;  %v201_v3 = vld [vmem:[%s184_s16 + $0x8] sm:$0xff]  ;;  %s198_s23 = scalar_lea.vmem %s684_s2, %s545_s13 }
  0x12   : > { %224 = vperm.xlu1 %575, %v200_v2   ;;  %205 = vperm.xlu0 %574, %v200_v2   ;;  %v202_v9 = vld [vmem:[%s189_s20] sm:$0xff] }
  0x13   : > { %v234_v10 = vrot.slane %v202_v9, %v233_v7  ;;  %v216_v12 = vrot.slane %v202_v9, %v215_v8  ;;  %v252_v21 = vrot.slane %v202_v9, %v251_v14 }
  0x16   : > { %228 = vperm.xlu1 %575, %v201_v3   ;;  %210 = vperm.xlu0 %574, %v201_v3  }
  0x1a   : > { %577 = vset.pattern.permute.xlu1 %v604_v4  ;;  %576 = vset.pattern.permute.xlu0 %v604_v4 }
  0x1b   : > { %246 = vperm.xlu1 %577, %v201_v3   ;;  %242 = vperm.xlu0 %576, %v200_v2  }
  0x91   : > { %v225_v11 = vpop.permute.xlu1 %224  ;;  %v206_v13 = vpop.permute.xlu0 %205 }
  0x92   : > { %v235_v15 = vsub.f32 %v225_v11, %v234_v10  ;;  %v217_v16 = vsub.f32 %v206_v13, %v216_v12 }
  0x94   : > { %v237_v22 = vmul.f32 %v235_v15, %v235_v15  ;;  %v219_v23 = vmul.f32 %v217_v16, %v217_v16 }
  0x95   : > { %v229_v17 = vpop.permute.xlu1 %228  ;;  %v211_v18 = vpop.permute.xlu0 %210 }
  0x96   : > { %v236_v19 = vsub.f32 %v229_v17, %v234_v10  ;;  %v218_v20 = vsub.f32 %v211_v18, %v216_v12  ;;  %v239_v30 = vadd.f32 %v237_v22, %v219_v23 }
  0x98   : > { %v238_v24 = vmul.f32 %v236_v19, %v236_v19  ;;  %v220_v25 = vmul.f32 %v218_v20, %v218_v20 }
  0x9a   : > { %v247_v26 = vpop.permute.xlu1 %246  ;;  %v243_v27 = vpop.permute.xlu0 %242  ;;  %v240_v31 = vadd.f32 %v238_v24, %v220_v25 }
  0x9b   : > { %v254_v28 = vsub.f32 %v247_v26, %v252_v21  ;;  %v253_v29 = vsub.f32 %v243_v27, %v252_v21 }
  0x9d   : > { %v256_v32 = vmul.f32 %v254_v28, %v254_v28  ;;  %v255_v33 = vmul.f32 %v253_v29, %v253_v29 }
  0x9f   : > { %v258_v36 = vadd.f32 %v256_v32, %v240_v31  ;;  %v257_v37 = vadd.f32 %v255_v33, %v239_v30 }
  0xa1   : > { %v271_v38 = vand.u32 4294967280, %v258_v36  ;;  %v270_v39 = vand.u32 4294967280, %v257_v37 }
  0xa3   : > { %v273_v40 = vor.u32 %v271_v38, %v650_v34  ;;  %v272_v41 = vor.u32 %v270_v39, %v650_v34 }
  0xa5   : > { %v277_v42 = vsel %vm275_vm0, 2147483647, %v273_v40  ;;  %v276_v43 = vsel %vm274_vm1, 2147483647, %v272_v41 }
  0xa6   : > { %v294_v44 = vsel %vm278_vm2, %v277_v42, 2147483647  ;;  %v279_v45 = vsel %vm278_vm2, %v276_v43, 2147483647 }
  0xa7   : > { %v296_v46 = vshra.s32 %v294_v44, 16  ;;  %v281_v47 = vshra.s32 %v279_v45, 16  ;;  %v280_v50 = vand.u32 65535, %v279_v45  ;;  %v295_v51 = vand.u32 65535, %v294_v44 }
  0xa9   : > { %v298_v48 = vcvt.s32.f32 %v296_v46  ;;  %v283_v49 = vcvt.s32.f32 %v281_v47  ;;  %v282_v54 = vcvt.s32.f32 %v280_v50  ;;  %v297_v55 = vcvt.s32.f32 %v295_v51 }
  0xab   : > { %299 = vmin.xlane.f32.xlu0 %v298_v48  ;;  %284 = vmin.xlane.f32.xlu1 %v283_v49 }
 0x138   : > { %v285_v52 = vpop.xlane.xlu1 %284  ;;  %v300_v53 = vpop.xlane.xlu0 %299 }
 0x139   : > { %vm286_vm3 = vcmp.eq.f32.partialorder %v283_v49, %v285_v52  ;;  %vm301_vm4 = vcmp.eq.f32.partialorder %v298_v48, %v300_v53  ;;  %v291_v58 = vcvt.f32.s32 %v285_v52  ;;  %v306_v59 = vcvt.f32.s32 %v300_v53 }
 0x13a   : > { %v287_v56 = vsel %vm286_vm3, %v282_v54, inf  ;;  %v302_v57 = vsel %vm301_vm4, %v297_v55, inf }
 0x13b   : > { %288 = vmin.xlane.f32.xlu0 %v287_v56  ;;  %303 = vmin.xlane.f32.xlu1 %v302_v57  ;;  %v292_v62 = vshll.u32 %v291_v58, 16  ;;  %v307_v63 = vshll.u32 %v306_v59, 16 }
 0x1c8   : > { %v304_v60 = vpop.xlane.xlu1 %303  ;;  %v289_v61 = vpop.xlane.xlu0 %288 }
 0x1c9   : > { %v305_v0 = vcvt.f32.s32 %v304_v60  ;;  %v290_v1 = vcvt.f32.s32 %v289_v61 }
 0x1cb   : > { %v308_v2 = vadd.s32 %v307_v63, %v305_v0  ;;  %v293_v3 = vadd.s32 %v292_v62, %v290_v1 }
 0x1cd   : > { %vm315_vm5 = vcmp.eq.s32.totalorder %v277_v42, %v308_v2  ;;  %vm314_vm6 = vcmp.eq.s32.totalorder %v276_v43, %v293_v3  ;;  %v310_v28 = vand.u32 15, %v308_v2  ;;  %v309_v29 = vand.u32 15, %v293_v3 }
 0x1ce   : > { %v317_v4 = vsel %vm315_vm5, 2147483647, %v277_v42  ;;  %v316_v5 = vsel %vm314_vm6, 2147483647, %v276_v43  ;;  %vm431_vm5 = vcmask 31744  }
 0x1cf   : > { %v333_v6 = vsel %vm278_vm2, %v317_v4, 2147483647  ;;  %v318_v7 = vsel %vm278_vm2, %v316_v5, 2147483647  ;;  %v313_v35 = vsel %vm311_vm9, %v310_v28, 0  ;;  %v312_v36 = vsel %vm311_vm9, %v309_v29, 0 }
 0x1d0   : > { %v335_v8 = vshra.s32 %v333_v6, 16  ;;  %v320_v9 = vshra.s32 %v318_v7, 16  ;;  %v334_v12 = vand.u32 65535, %v333_v6  ;;  %v319_v13 = vand.u32 65535, %v318_v7 }
 0x1d2   : > { %v337_v10 = vcvt.s32.f32 %v335_v8  ;;  %v322_v11 = vcvt.s32.f32 %v320_v9  ;;  %v336_v16 = vcvt.s32.f32 %v334_v12  ;;  %v321_v17 = vcvt.s32.f32 %v319_v13 }
 0x1d4   : > { %338 = vmin.xlane.f32.xlu1 %v337_v10  ;;  %323 = vmin.xlane.f32.xlu0 %v322_v11 }
 0x261   : > { %v339_v14 = vpop.xlane.xlu1 %338  ;;  %v324_v15 = vpop.xlane.xlu0 %323 }
 0x262   : > { %vm340_vm7 = vcmp.eq.f32.partialorder %v337_v10, %v339_v14  ;;  %vm325_vm8 = vcmp.eq.f32.partialorder %v322_v11, %v324_v15  ;;  %v345_v20 = vcvt.f32.s32 %v339_v14  ;;  %v330_v21 = vcvt.f32.s32 %v324_v15 }
 0x263   : > { %v341_v18 = vsel %vm340_vm7, %v336_v16, inf  ;;  %v326_v19 = vsel %vm325_vm8, %v321_v17, inf }
 0x264   : > { %342 = vmin.xlane.f32.xlu1 %v341_v18  ;;  %327 = vmin.xlane.f32.xlu0 %v326_v19  ;;  %v346_v24 = vshll.u32 %v345_v20, 16  ;;  %v331_v25 = vshll.u32 %v330_v21, 16 }
 0x2f1   : > { %v343_v22 = vpop.xlane.xlu1 %342  ;;  %v328_v23 = vpop.xlane.xlu0 %327 }
 0x2f2   : > { %v344_v26 = vcvt.f32.s32 %v343_v22  ;;  %v329_v27 = vcvt.f32.s32 %v328_v23 }
 0x2f4   : > { %v347_v30 = vadd.s32 %v346_v24, %v344_v26  ;;  %v332_v31 = vadd.s32 %v331_v25, %v329_v27 }
 0x2f6   : > { %v349_v32 = vand.u32 15, %v347_v30  ;;  %vm354_vm11 = vcmp.eq.s32.totalorder %v317_v4, %v347_v30  ;;  %v348_v33 = vand.u32 15, %v332_v31  ;;  %vm353_vm12 = vcmp.eq.s32.totalorder %v316_v5, %v332_v31 }
 0x2f7   : > { %v356_v37 = vsel %vm354_vm11, 2147483647, %v317_v4  ;;  %v355_v38 = vsel %vm353_vm12, 2147483647, %v316_v5 }
 0x2f8   : > { %v352_v39 = vsel %vm350_vm10, %v349_v32, %v313_v35  ;;  %v351_v40 = vsel %vm350_vm10, %v348_v33, %v312_v36  ;;  %v372_v41 = vsel %vm278_vm2, %v356_v37, 2147483647  ;;  %v357_v42 = vsel %vm278_vm2, %v355_v38, 2147483647 }
 0x2f9   : > { %v374_v43 = vshra.s32 %v372_v41, 16  ;;  %v359_v44 = vshra.s32 %v357_v42, 16  ;;  %v373_v47 = vand.u32 65535, %v372_v41  ;;  %v358_v48 = vand.u32 65535, %v357_v42 }
 0x2fb   : > { %v376_v45 = vcvt.s32.f32 %v374_v43  ;;  %v361_v46 = vcvt.s32.f32 %v359_v44  ;;  %v375_v51 = vcvt.s32.f32 %v373_v47  ;;  %v360_v52 = vcvt.s32.f32 %v358_v48 }
 0x2fd   : > { %377 = vmin.xlane.f32.xlu1 %v376_v45  ;;  %362 = vmin.xlane.f32.xlu0 %v361_v46 }
 0x38a   : > { %v378_v49 = vpop.xlane.xlu1 %377  ;;  %v363_v50 = vpop.xlane.xlu0 %362 }
 0x38b   : > { %vm379_vm13 = vcmp.eq.f32.partialorder %v376_v45, %v378_v49  ;;  %vm364_vm14 = vcmp.eq.f32.partialorder %v361_v46, %v363_v50  ;;  %v384_v55 = vcvt.f32.s32 %v378_v49  ;;  %v369_v56 = vcvt.f32.s32 %v363_v50 }
 0x38c   : > { %v380_v53 = vsel %vm379_vm13, %v375_v51, inf  ;;  %v365_v54 = vsel %vm364_vm14, %v360_v52, inf }
 0x38d   : > { %381 = vmin.xlane.f32.xlu1 %v380_v53  ;;  %366 = vmin.xlane.f32.xlu0 %v365_v54  ;;  %v385_v59 = vshll.u32 %v384_v55, 16  ;;  %v370_v60 = vshll.u32 %v369_v56, 16 }
 0x41a   : > { %v382_v57 = vpop.xlane.xlu1 %381  ;;  %v367_v58 = vpop.xlane.xlu0 %366 }
 0x41b   : > { %v383_v61 = vcvt.f32.s32 %v382_v57  ;;  %v368_v62 = vcvt.f32.s32 %v367_v58 }
 0x41d   : > { %v386_v63 = vadd.s32 %v385_v59, %v383_v61  ;;  %v371_v0 = vadd.s32 %v370_v60, %v368_v62 }
 0x41f   : > { %v388_v1 = vand.u32 15, %v386_v63  ;;  %vm393_vm0 = vcmp.eq.s32.totalorder %v356_v37, %v386_v63  ;;  %v387_v2 = vand.u32 15, %v371_v0  ;;  %vm392_vm1 = vcmp.eq.s32.totalorder %v355_v38, %v371_v0 }
 0x420   : > { %v395_v3 = vsel %vm393_vm0, 2147483647, %v356_v37  ;;  %v394_v4 = vsel %vm392_vm1, 2147483647, %v355_v38 }
 0x421   : > { %v411_v5 = vsel %vm278_vm2, %v395_v3, 2147483647  ;;  %v396_v6 = vsel %vm278_vm2, %v394_v4, 2147483647  ;;  %v391_v7 = vsel %vm389_vm15, %v388_v1, %v352_v39  ;;  %v390_v8 = vsel %vm389_vm15, %v387_v2, %v351_v40 }
 0x422   : > { %v413_v9 = vshra.s32 %v411_v5, 16  ;;  %v398_v10 = vshra.s32 %v396_v6, 16  ;;  %v412_v13 = vand.u32 65535, %v411_v5  ;;  %v397_v14 = vand.u32 65535, %v396_v6 }
 0x423   : > { %vm428_vm2 = vcmp.eq.s32.totalorder %v650_v34, 3 }
 0x424   : > { %v415_v11 = vcvt.s32.f32 %v413_v9  ;;  %v400_v12 = vcvt.s32.f32 %v398_v10  ;;  %v414_v17 = vcvt.s32.f32 %v412_v13  ;;  %v399_v18 = vcvt.s32.f32 %v397_v14 }
 0x426   : > { %416 = vmin.xlane.f32.xlu1 %v415_v11  ;;  %401 = vmin.xlane.f32.xlu0 %v400_v12 }
 0x4b3   : > { %v417_v15 = vpop.xlane.xlu1 %416  ;;  %v402_v16 = vpop.xlane.xlu0 %401 }
 0x4b4   : > { %vm418_vm3 = vcmp.eq.f32.partialorder %v415_v11, %v417_v15  ;;  %vm403_vm4 = vcmp.eq.f32.partialorder %v400_v12, %v402_v16  ;;  %v423_v21 = vcvt.f32.s32 %v417_v15  ;;  %v408_v22 = vcvt.f32.s32 %v402_v16 }
 0x4b5   : > { %v419_v19 = vsel %vm418_vm3, %v414_v17, inf  ;;  %v404_v20 = vsel %vm403_vm4, %v399_v18, inf }
 0x4b6   : > { %420 = vmin.xlane.f32.xlu1 %v419_v19  ;;  %405 = vmin.xlane.f32.xlu0 %v404_v20  ;;  %v424_v25 = vshll.u32 %v423_v21, 16  ;;  %v409_v26 = vshll.u32 %v408_v22, 16 }
 0x543   : > { %v421_v23 = vpop.xlane.xlu1 %420  ;;  %v406_v24 = vpop.xlane.xlu0 %405 }
 0x544   : > { %v422_v27 = vcvt.f32.s32 %v421_v23  ;;  %v407_v28 = vcvt.f32.s32 %v406_v24 }
 0x546   : > { %v425_v29 = vadd.s32 %v424_v25, %v422_v27  ;;  %v410_v30 = vadd.s32 %v409_v26, %v407_v28 }
 0x548   : > { %v427_v31 = vand.u32 15, %v425_v29  ;;  %v426_v32 = vand.u32 15, %v410_v30 }
 0x54a   : > { %v430_v33 = vsel %vm428_vm2, %v427_v31, %v391_v7  ;;  %v429_v35 = vsel %vm428_vm2, %v426_v32, %v390_v8 }
 0x54b   : > { %433 = vst.msk [vmem:[%s198_s23 + $0x8] sm:$0xff] %vm431_vm5, %v430_v33  ;;  %432 = vst.msk [vmem:[%s198_s23] sm:$0xff] %vm431_vm5, %v429_v35 }
 0x54c PF: > { %s12_s11 = sadd.s32 1, %s600_s11   ;;  %s685_s9 = smov %s596_s10 }
 0x54d   : > { %p9_p5 = scmp.ge.s32.totalorder %s12_s11, 4   ;;  %s686_s10 = smov %s688_s12 }
 0x54f   :  { %11 = sbr.rel (!%p9_p5) target bundleno = 2 (0x2), region = 61 }

</bundles_post_ra>
